<compile_context>
chip_gen: v7x
topology: tpu7x:2x2x1
jax: 0.10.0
libtpu: 0.0.40
codegen_flags: <defaults>
</compile_context>

<pallas_src>
import math

import jax
import jax.numpy as jnp
from jax.experimental import pallas as pl
from jax.experimental.pallas import tpu as pltpu


# ---------------------------------------------------------------------------
# Kernels
# ---------------------------------------------------------------------------
def _add_tables_kernel_2d(x_ref, pe_ref, lpe_ref, o_ref):
    # x_ref / o_ref: (tR, L)   (leading batch dim squeezed away by BlockSpec)
    # pe_ref / lpe_ref: (tR, L)
    # Two VPU adds; kernel is HBM-bandwidth bound so the extra add is free.
    o_ref[...] = (x_ref[...] + pe_ref[...] + lpe_ref[...]).astype(o_ref.dtype)


def _add_tables_kernel_3d(x_ref, pe_ref, lpe_ref, o_ref):
    # Tiny-input path: whole arrays in a single lane-dense block.
    t = pe_ref[...] + lpe_ref[...]
    o_ref[...] = (x_ref[...] + t[None, :, :]).astype(o_ref.dtype)


# ---------------------------------------------------------------------------
# Wrapper
# ---------------------------------------------------------------------------
def positional_encoding_forward(x, pe, learnable_pe):
    """x: (B, S, D); pe, learnable_pe: (max_len, D). Returns (B, S, D)."""
    B, S, D = x.shape
    max_len, d_model = pe.shape
    assert d_model == D and learnable_pe.shape == pe.shape
    if S > max_len:
        raise RuntimeError(
            "Input sequence length exceeds maximum positional encoding length.")

    # ---- lane-dense 2-D view (R, L) of the (S, D) slab ---------------------
    F = S * D
    if D % 128 == 0:
        R, L = S, D
    elif F % 128 == 0:
        R, L = F // 128, 128
    else:
        # TODO(synk): non-128-multiple last dim falls back to masked partial
        # stores (correct but slower); padding D would cost more HBM traffic
        # than it saves for this streaming add.
        R, L = S, D

    xv = x.reshape(B, R, L)
    itemsize = x.dtype.itemsize
    x_bytes = B * R * L * itemsize

    def cdiv(a, b):
        return -(-a // b)

    def table_view(t, exact_rows):
        # 2-D (rows, L) view whose first R rows are pe[:S]/learnable_pe[:S].
        # Prefer copy-free contiguous reshapes of the FULL table; only slice
        # (materializing a small copy) when an exact (R, L) shape is required.
        if exact_rows:
            return t[:S].reshape(R, L)
        if L == D:
            return t                                    # (max_len, D), rows 0..S-1 used
        if (max_len * D) % L == 0:
            return t.reshape((max_len * D) // L, L)     # contiguous reshape, no copy
        return t[:S].reshape(R, L)

    cost = pl.CostEstimate(
        flops=2 * B * S * D,
        transcendentals=0,
        bytes_accessed=2 * B * S * D * itemsize
        + S * D * (pe.dtype.itemsize + learnable_pe.dtype.itemsize),
    )

    # ---------------- tiny-input fast path: a single lane-dense block -------
    if x_bytes <= (2 << 20):
        pev = table_view(pe, exact_rows=True)
        lpev = table_view(learnable_pe, exact_rows=True)
        out = pl.pallas_call(
            _add_tables_kernel_3d,
            out_shape=jax.ShapeDtypeStruct((B, R, L), x.dtype),
            grid_spec=pltpu.PrefetchScalarGridSpec(
                num_scalar_prefetch=0,
                grid=(1,),
                in_specs=[
                    pl.BlockSpec((B, R, L), lambda i: (0, 0, 0)),   # x
                    pl.BlockSpec((R, L), lambda i: (0, 0)),         # pe
                    pl.BlockSpec((R, L), lambda i: (0, 0)),         # learnable_pe
                ],
                out_specs=pl.BlockSpec((B, R, L), lambda i: (0, 0, 0)),
            ),
            compiler_params=pltpu.CompilerParams(
                dimension_semantics=("arbitrary",)),
            cost_estimate=cost,
        )(xv, pev, lpev)
        return out.reshape(B, S, D)

    # ---------------- production path: tile rows, batch innermost -----------
    # VMEM-aware block sizing (v5e/v6e: 128 MiB physical -> ~4 MiB x blocks;
    # v7x: 64 MiB -> ~2 MiB).  vmem_limit_bytes set explicitly below.
    try:
        vmem_cap = int(pltpu.get_tpu_info().vmem_capacity_bytes)
    except Exception:
        vmem_cap = 64 << 20   # conservative (v7x-sized) fallback
    target_block = (4 << 20) if vmem_cap >= (100 << 20) else (2 << 20)

    # dtype-aware sublane tile: 8 rows f32, 16 bf16, 32 int8/fp8.
    sub = max(8, 32 // itemsize)
    target_rows = max(sub, target_block // (L * itemsize))

    if R <= sub:
        tR = R
    else:
        tR = max(sub, min((target_rows // sub) * sub, (R // sub) * sub))
        # v7x has 2 TensorCores: when B == 1 make sure the row axis alone
        # yields at least 2 tiles so the parallel grid can actually be split.
        if B == 1 and cdiv(R, tR) < 2 and R > sub:
            half = cdiv(R, 2)
            tR = max(sub, min(tR, cdiv(half, sub) * sub))
        # Prefer a tR that divides R: avoids a masked remainder tile that
        # would be revisited B times (batch is the inner grid axis).
        probe = tR
        for _ in range(64):
            if probe < sub or probe < tR // 2:
                break
            if R % probe == 0:
                tR = probe
                break
            probe -= sub

    # If tR is not sublane-aligned (only possible when tR == R < sub), slice
    # the tables so the block rows equal the full table-view rows.
    need_exact = (tR % 8 != 0)
    pev = table_view(pe, exact_rows=need_exact)
    lpev = table_view(learnable_pe, exact_rows=need_exact)

    # Explicit VMEM budget: double-buffered x, out, pe, lpe blocks + headroom.
    x_blk = tR * L * itemsize
    t_blk = tR * L * (pe.dtype.itemsize + learnable_pe.dtype.itemsize)
    working_set = 2 * (2 * x_blk + t_blk)
    vmem_limit = max(working_set + (8 << 20), 24 << 20)
    vmem_limit = min(vmem_limit, int(0.75 * vmem_cap))
    vmem_limit = max(vmem_limit, working_set + (2 << 20))

    grid = (cdiv(R, tR), B)   # batch innermost -> table tiles stay VMEM-resident

    out = pl.pallas_call(
        _add_tables_kernel_2d,
        out_shape=jax.ShapeDtypeStruct((B, R, L), x.dtype),
        grid_spec=pltpu.PrefetchScalarGridSpec(
            num_scalar_prefetch=0,
            grid=grid,
            in_specs=[
                # leading batch dim squeezed out of the kernel view
                pl.BlockSpec((None, tR, L), lambda s, b: (b, s, 0)),   # x
                pl.BlockSpec((tR, L), lambda s, b: (s, 0)),            # pe
                pl.BlockSpec((tR, L), lambda s, b: (s, 0)),            # learnable_pe
            ],
            out_specs=pl.BlockSpec((None, tR, L), lambda s, b: (b, s, 0)),
        ),
        compiler_params=pltpu.CompilerParams(
            dimension_semantics=("parallel", "parallel"),
            vmem_limit_bytes=int(vmem_limit),
        ),
        cost_estimate=cost,
    )(xv, pev, lpev)
    return out.reshape(B, S, D)


# ---------------------------------------------------------------------------
# Table construction (mirrors PositionalEncoding.__init__)
# ---------------------------------------------------------------------------
def make_sinusoidal_pe(max_len, d_model, dtype=jnp.float32):
    position = jnp.arange(0, max_len, dtype=jnp.float32)[:, None]        # (max_len, 1)
    div_term = jnp.exp(jnp.arange(0, d_model, 2, dtype=jnp.float32)
                       * (-math.log(10000.0) / d_model))                 # (ceil(d/2),)
    angles = position * div_term                                         # (max_len, ceil(d/2))
    pe = jnp.zeros((max_len, d_model), dtype=jnp.float32)
    pe = pe.at[:, 0::2].set(jnp.sin(angles))
    pe = pe.at[:, 1::2].set(jnp.cos(angles[:, : d_model // 2]))
    return pe.astype(dtype)


if __name__ == "__main__":
    key = jax.random.PRNGKey(0)
    kx, kp, kx2, kp2 = jax.random.split(key, 4)

    # --- small demo shapes consistent with the module (batch, seq, d_model) ---
    B, S, D = 2, 8, 32
    MAX_LEN = 64
    x = jax.random.normal(kx, (B, S, D), dtype=jnp.float32)
    pe = make_sinusoidal_pe(MAX_LEN, D)
    # __init__ zero-inits learnable_pe; use small deterministic values so the
    # add is non-trivial for the correctness check.
    learnable_pe = 0.02 * jax.random.normal(kp, (MAX_LEN, D), dtype=jnp.float32)

    out = positional_encoding_forward(x, pe, learnable_pe)
    out = jax.block_until_ready(out)
    ref = x + pe[:S, :] + learnable_pe[:S, :]
    assert out.shape == (B, S, D)
    assert jnp.allclose(out, ref, atol=1e-6), "mismatch vs reference (small path)"

    # --- moderate shape to exercise the tiled (row-tiles, batch) path ---------
    # S2 chosen non-power-of-two to exercise the divisor-aligned tR logic.
    B2, S2, D2 = 2, 6000, 512
    MAX_LEN2 = 6000
    x2 = jax.random.normal(kx2, (B2, S2, D2), dtype=jnp.float32)
    pe2 = make_sinusoidal_pe(MAX_LEN2, D2)
    lpe2 = 0.02 * jax.random.normal(kp2, (MAX_LEN2, D2), dtype=jnp.float32)

    out2 = positional_encoding_forward(x2, pe2, lpe2)
    out2 = jax.block_until_ready(out2)
    ref2 = x2 + pe2[:S2, :] + lpe2[:S2, :]
    assert out2.shape == (B2, S2, D2)
    assert jnp.allclose(out2, ref2, atol=1e-5), "mismatch vs reference (tiled path)"

    print("KERNEL_OK")
</pallas_src>

<mosaic_0001>
module attributes {stable_mosaic.version = 11 : i64} {
  func.func @_add_tables_kernel_3d(%arg0: i32, %arg1: memref<2x2x128xf32, #tpu.memory_space<vmem>>, %arg2: memref<2x128xf32, #tpu.memory_space<vmem>>, %arg3: memref<2x128xf32, #tpu.memory_space<vmem>>, %arg4: memref<2x2x128xf32, #tpu.memory_space<vmem>>) attributes {dimension_semantics = [#tpu.dimension_semantics<arbitrary>], iteration_bounds = array<i64: 1>, scalar_prefetch = 0 : i64, scratch_operands = 0 : i64, tpu.core_type = #tpu.core_type<tc>, window_params = [{pipeline_mode = #tpu.pipeline_mode<synchronous>, transform_indices = @transform_0, window_bounds = array<i64: 2, 2, 128>}, {pipeline_mode = #tpu.pipeline_mode<synchronous>, transform_indices = @transform_1, window_bounds = array<i64: 2, 128>}, {pipeline_mode = #tpu.pipeline_mode<synchronous>, transform_indices = @transform_2, window_bounds = array<i64: 2, 128>}, {pipeline_mode = #tpu.pipeline_mode<synchronous>, transform_indices = @transform_3, window_bounds = array<i64: 2, 2, 128>}]} {
    %c0 = arith.constant 0 : index
    %c0_0 = arith.constant 0 : index
    %0 = vector.load %arg2[%c0, %c0_0] : memref<2x128xf32, #tpu.memory_space<vmem>>, vector<2x128xf32>
    %c0_1 = arith.constant 0 : index
    %c0_2 = arith.constant 0 : index
    %1 = vector.load %arg3[%c0_1, %c0_2] : memref<2x128xf32, #tpu.memory_space<vmem>>, vector<2x128xf32>
    %2 = arith.addf %0, %1 : vector<2x128xf32>
    %c0_3 = arith.constant 0 : index
    %c0_4 = arith.constant 0 : index
    %c0_5 = arith.constant 0 : index
    %3 = vector.load %arg1[%c0_3, %c0_4, %c0_5] : memref<2x2x128xf32, #tpu.memory_space<vmem>>, vector<2x2x128xf32>
    %4 = vector.shape_cast %2 : vector<2x128xf32> to vector<1x2x128xf32>
    %5 = vector.broadcast %4 : vector<1x2x128xf32> to vector<2x2x128xf32>
    %6 = arith.addf %3, %5 : vector<2x2x128xf32>
    %c0_6 = arith.constant 0 : index
    %c0_7 = arith.constant 0 : index
    %c0_8 = arith.constant 0 : index
    %7 = vector.load %arg4[%c0_6, %c0_7, %c0_8] : memref<2x2x128xf32, #tpu.memory_space<vmem>>, vector<2x2x128xf32>
    tpu.vector_store %arg4[%c0_6, %c0_7, %c0_8], %6 {strides = array<i32>} : memref<2x2x128xf32, #tpu.memory_space<vmem>>, vector<2x2x128xf32>,
    return
  }
  func.func @transform_0(%arg0: i32) -> (i32, i32, i32) {
    %c0_i32 = arith.constant 0 : i32
    %c0_i32_0 = arith.constant 0 : i32
    %c0_i32_1 = arith.constant 0 : i32
    %c0_i32_2 = arith.constant 0 : i32
    return %c0_i32, %c0_i32_0, %c0_i32_1 : i32, i32, i32
  }
  func.func @transform_1(%arg0: i32) -> (i32, i32) {
    %c0_i32 = arith.constant 0 : i32
    %c0_i32_0 = arith.constant 0 : i32
    %c0_i32_1 = arith.constant 0 : i32
    return %c0_i32, %c0_i32_0 : i32, i32
  }
  func.func @transform_2(%arg0: i32) -> (i32, i32) {
    %c0_i32 = arith.constant 0 : i32
    %c0_i32_0 = arith.constant 0 : i32
    %c0_i32_1 = arith.constant 0 : i32
    return %c0_i32, %c0_i32_0 : i32, i32
  }
  func.func @transform_3(%arg0: i32) -> (i32, i32, i32) {
    %c0_i32 = arith.constant 0 : i32
    %c0_i32_0 = arith.constant 0 : i32
    %c0_i32_1 = arith.constant 0 : i32
    %c0_i32_2 = arith.constant 0 : i32
    return %c0_i32, %c0_i32_0, %c0_i32_1 : i32, i32, i32
  }
}

</mosaic_0001>

<bundles_post_ra>
// kernel: tpu_custom_call.1
= control target key start
LH: loop header
LB: loop body
LE: loop exit
PB: predicated region body
PF: predicated region fallthrough
CT: control target
= control target key end

     0   :  { %8 = vsyncpa [#allocation3], 0  ;;  %s167_s0 = inlined_call_operand.hbm [shape: f32[2,2,128], index: 0, kind: input, shape index: {}]   ;;  %s168_s1 = inlined_call_operand.vmem [shape: f32[2,128], index: 1, kind: input, shape index: {}]   ;;  %s169_s2 = inlined_call_operand.vmem [shape: f32[2,128], index: 2, kind: input, shape index: {}]   ;;  %s170_s3 = inlined_call_operand.hbm [shape: f32[2,2,128], index: 3, kind: output, shape index: {}]  }
   0x1   :  { %9 = vsyncpa [#allocation4], 0  ;;  %s107_s12 = smov [#allocation2]   ;;  %s59_s16 = scalar_lea.hbm %s167_s0, 64 }
   0x2   :  { %s15_s13 = sshll.u32 %s107_s12, 4  ;;  %p60_p0 = scmp.ne.s32.totalorder %s167_s0, %s59_s16  ;;  %s16_s13 = int_to_ptr.vmem [resolvable:$true] %s15_s13 }
   0x3   :  { %p63_p1 = scmp.lt.u32.totalorder %s59_s16, %s167_s0 }
   0x5   :  { %p65_p2 = pnand %p63_p1, %p60_p0 }
   0x7   :  { %68 = shalt.err (!%p65_p2)
}
   0x8   :  { %s69_s21 = scalar_lea.vmem %s16_s13, 64  ;;  %p74_p4 = scmp.lt.s32.totalorder %s16_s13, %s16_s13 }
   0x9   :  { %p70_p3 = scmp.ne.s32.totalorder %s16_s13, %s69_s21  ;;  %p75_p5 = scmp.lt.s32.totalorder %s69_s21, %s69_s21 }
   0xb   :  { %p76_p6 = por %p75_p5, %p74_p4 }
   0xd   :  { %p77_p7 = pnand %p76_p6, %p70_p3 }
   0xf   :  { %80 = shalt.err (!%p77_p7)
}
  0x10   :  { %s108_s22 = smov 32   ;;  %s109_s23 = smov 2  }
  0x11   :  { %21 = dma.hbm_to_vmem [thread:$0]  %s167_s0, 64, %s16_s13, [#allocation3], %s108_s22, %s108_s22, %s109_s23  }
  0x12   :  { %103 = dma.done.wait [#allocation3], 64  }
  0x13   :  { %104 = vsyncadd [#allocation3], 4294967232  ;;  %s110_s26 = smov [#allocation5]   ;;  %v29_v0 = vld [vmem:[%s168_s1] sm:$0x3] }
  0x14   :  { %s43_s27 = sshll.u32 %s110_s26, 4  ;;  %v30_v1 = vld [vmem:[%s169_s2] sm:$0x3]  ;;  %v33_v4 = vld [vmem:[#allocation2 + $0x2] sm:$0x3]  ;;  %s44_s27 = int_to_ptr.vmem [resolvable:$true] %s43_s27 }
  0x15   :  { %v32_v2 = vld [vmem:[#allocation2] sm:$0x3]  ;;  %v31_v3 = vadd.f32 %v30_v1, %v29_v0  ;;  %s81_s0 = scalar_lea.vmem %s44_s27, 64  ;;  %p86_p9 = scmp.lt.s32.totalorder %s44_s27, %s44_s27 }
  0x16   :  { %p82_p8 = scmp.ne.s32.totalorder %s44_s27, %s81_s0  ;;  %p87_p10 = scmp.lt.s32.totalorder %s81_s0, %s81_s0 }
  0x17   :  { %v34_v5 = vadd.f32 %v32_v2, %v31_v3  ;;  %v35_v6 = vadd.f32 %v33_v4, %v31_v3 }
  0x18   :  { %p88_p11 = por %p87_p10, %p86_p9 }
  0x19   :  { %36 = vst [vmem:[#allocation5] sm:$0x3] %v34_v5  ;;  %37 = vst [vmem:[#allocation5 + $0x2] sm:$0x3] %v35_v6 }
  0x1a   :  { %p89_p12 = pnand %p88_p11, %p82_p8 }
  0x1c   :  { %92 = shalt.err (!%p89_p12)
}
  0x1d   :  { %s93_s6 = scalar_lea.hbm %s170_s3, 64 }
  0x1e   :  { %p94_p13 = scmp.ne.s32.totalorder %s170_s3, %s93_s6  ;;  %p97_p0 = scmp.lt.u32.totalorder %s93_s6, %s170_s3 }
  0x20   :  { %p99_p1 = pnand %p97_p0, %p94_p13 }
  0x22   :  { %102 = shalt.err (!%p99_p1)
}
  0x23   :  { %49 = dma.vmem_to_hbm [thread:$0]  %s44_s27, 64, %s170_s3, [#allocation4], %s108_s22, %s108_s22, %s109_s23  }
  0x24   :  { %105 = dma.done.wait [#allocation4], 64  }
  0x25   :  { %106 = vsyncadd [#allocation4], 4294967232 }
  0x26   :  { %53 = vsyncpa [#allocation3], 1 }
  0x27   :  { %54 = vsyncpa [#allocation4], 1 }

</bundles_post_ra>
